<compile_context>
chip_gen: v6e
topology: v6e:2x2x1
jax: 0.10.0
libtpu: 0.0.40
codegen_flags: <defaults>
</compile_context>

<pallas_src>
import functools
import math

import jax
import jax.numpy as jnp
from jax.experimental import pallas as pl
from jax.experimental.pallas import tpu as pltpu


def _pffn_kernel(seed_ref, x_ref, w1_ref, b1_ref, w2_ref, b2_ref, out_ref, *,
                 drop_p, training):
    """One row-tile of the position-wise FFN: w2(dropout(gelu(w1(x))))."""
    x = x_ref[...]                                    # [TR, d_model] f32

    # ---- w_1: d_model -> d_ff (bf16 MXU operands, f32 accumulator) ----
    h = jnp.dot(x.astype(jnp.bfloat16), w1_ref[...],
                preferred_element_type=jnp.float32)
    h = h + b1_ref[...]

    # ---- GELU ----
    # TODO(synk): PyTorch F.gelu defaults to the exact erf form; we use the
    # tanh approximation since lax.erf has no guaranteed Mosaic lowering.
    h = jax.nn.gelu(h, approximate=True)

    # ---- dropout (inverted dropout; path only compiled when p>0 & training) ----
    if training and drop_p > 0.0:
        pltpu.prng_seed(seed_ref[0] + pl.program_id(0))
        bits = pltpu.prng_random_bits(h.shape)
        if bits.dtype != jnp.uint32:
            bits = pltpu.bitcast(bits, jnp.uint32)
        # keep with prob (1-p): raw uint32 bits vs precomputed uint32 threshold
        thresh = jnp.uint32(min(int(drop_p * 4294967296.0), 4294967295))
        keep = bits >= thresh
        h = jnp.where(keep, h * (1.0 / (1.0 - drop_p)), 0.0)

    # ---- w_2: d_ff -> d_model ----
    y = jnp.dot(h.astype(jnp.bfloat16), w2_ref[...],
                preferred_element_type=jnp.float32)
    y = y + b2_ref[...]
    out_ref[...] = y.astype(out_ref.dtype)


def pffn(x, w1, b1, w2, b2, seed, *, drop_p=0.0, training=False, row_tile=256):
    """x: [..., d_model]. w1: [d_model, d_ff], w2: [d_ff, d_model]."""
    *lead, d_model = x.shape
    d_ff = w1.shape[1]
    assert w1.shape == (d_model, d_ff) and w2.shape == (d_ff, d_model)

    x2 = x.reshape(-1, d_model)
    R = x2.shape[0]
    # row_tile is a multiple of 8/128; small R -> single full-extent block.
    TR = R if R <= row_tile else row_tile
    grid = (pl.cdiv(R, TR),)

    # Weights go to the MXU in bf16: halves resident VMEM + HBM traffic.
    w1_b = w1.astype(jnp.bfloat16)
    w2_b = w2.astype(jnp.bfloat16)
    b1_2 = b1.reshape(1, d_ff).astype(jnp.float32)
    b2_2 = b2.reshape(1, d_model).astype(jnp.float32)

    # Explicit VMEM budget: double-buffered x/out tiles + weights + f32 hidden.
    est = (2 * TR * d_model * 4          # x tiles (f32, double-buffered)
           + 2 * TR * d_model * 4        # out tiles
           + 2 * (d_model * d_ff + d_ff * d_model) * 2   # bf16 weights
           + 2 * (d_ff + d_model) * 4    # biases
           + 3 * TR * d_ff * 4)          # f32 intermediates
    vmem_limit = int(min(max(2 * est, 32 * 1024 * 1024), 48 * 1024 * 1024))

    kernel = functools.partial(_pffn_kernel, drop_p=float(drop_p),
                               training=bool(training))

    out = pl.pallas_call(
        kernel,
        out_shape=jax.ShapeDtypeStruct((R, d_model), x.dtype),
        grid_spec=pltpu.PrefetchScalarGridSpec(
            num_scalar_prefetch=1,               # dropout seed lands in SMEM
            grid=grid,
            in_specs=[
                pl.BlockSpec((TR, d_model), lambda i, seed_ref: (i, 0)),    # x
                pl.BlockSpec((d_model, d_ff), lambda i, seed_ref: (0, 0)),  # W1
                pl.BlockSpec((1, d_ff), lambda i, seed_ref: (0, 0)),        # b1
                pl.BlockSpec((d_ff, d_model), lambda i, seed_ref: (0, 0)),  # W2
                pl.BlockSpec((1, d_model), lambda i, seed_ref: (0, 0)),     # b2
            ],
            out_specs=pl.BlockSpec((TR, d_model), lambda i, seed_ref: (i, 0)),
        ),
        compiler_params=pltpu.CompilerParams(
            dimension_semantics=("parallel",),   # independent rows: 2 TCs on v7x
            vmem_limit_bytes=vmem_limit),
    )(seed, x2, w1_b, b1_2, w2_b, b2_2)
    return out.reshape(*lead, d_model)


def _reference(x, w1, b1, w2, b2):
    """Pure-JAX reference mirroring the kernel numerics (bf16 MXU, f32 acc)."""
    h = jnp.dot(x.astype(jnp.bfloat16), w1.astype(jnp.bfloat16),
                preferred_element_type=jnp.float32) + b1
    h = jax.nn.gelu(h, approximate=True)
    y = jnp.dot(h.astype(jnp.bfloat16), w2.astype(jnp.bfloat16),
                preferred_element_type=jnp.float32) + b2
    return y


if __name__ == "__main__":
    B, S = 2, 8
    d_model, d_ff = 32, 64

    key = jax.random.PRNGKey(0)
    kx, k1, kb1, k2, kb2 = jax.random.split(key, 5)

    x = jax.random.normal(kx, (B, S, d_model), dtype=jnp.float32)
    w1 = jax.random.normal(k1, (d_model, d_ff), jnp.float32) / math.sqrt(d_model)
    b1 = 0.1 * jax.random.normal(kb1, (d_ff,), jnp.float32)
    w2 = jax.random.normal(k2, (d_ff, d_model), jnp.float32) / math.sqrt(d_ff)
    b2 = 0.1 * jax.random.normal(kb2, (d_model,), jnp.float32)
    seed = jnp.array([0], dtype=jnp.int32)

    # PFFN default dropout=0  ->  forward is exactly w2(gelu(w1(x))).
    out = pffn(x, w1, b1, w2, b2, seed, drop_p=0.0, training=False)
    out = jax.block_until_ready(out)
    ref = _reference(x, w1, b1, w2, b2)
    assert out.shape == (B, S, d_model)
    assert bool(jnp.all(jnp.isfinite(out)))
    assert jnp.allclose(out, ref, atol=2e-2, rtol=2e-2), \
        float(jnp.max(jnp.abs(out - ref)))

    # Training-mode call with the module's default p=0 (dropout == identity).
    out_tr = pffn(x, w1, b1, w2, b2, seed, drop_p=0.0, training=True)
    out_tr = jax.block_until_ready(out_tr)
    assert jnp.allclose(out_tr, out, atol=1e-6)

    print("KERNEL_OK")
</pallas_src>

<mosaic_0001>
module attributes {stable_mosaic.version = 11 : i64} {
  func.func @_pffn_kernel(%arg0: i32, %arg1: memref<1xi32, #tpu.memory_space<smem>>, %arg2: memref<16x32xf32, #tpu.memory_space<vmem>>, %arg3: memref<32x64xbf16, #tpu.memory_space<vmem>>, %arg4: memref<1x64xf32, #tpu.memory_space<vmem>>, %arg5: memref<64x32xbf16, #tpu.memory_space<vmem>>, %arg6: memref<1x32xf32, #tpu.memory_space<vmem>>, %arg7: memref<16x32xf32, #tpu.memory_space<vmem>>) attributes {dimension_semantics = [#tpu.dimension_semantics<parallel>], iteration_bounds = array<i64: 1>, scalar_prefetch = 1 : i64, scratch_operands = 0 : i64, tpu.core_type = #tpu.core_type<tc>, window_params = [{transform_indices = @transform_0, window_bounds = array<i64: 16, 32>}, {pipeline_mode = #tpu.pipeline_mode<synchronous>, transform_indices = @transform_1, window_bounds = array<i64: 32, 64>}, {pipeline_mode = #tpu.pipeline_mode<synchronous>, transform_indices = @transform_2, window_bounds = array<i64: 1, 64>}, {pipeline_mode = #tpu.pipeline_mode<synchronous>, transform_indices = @transform_3, window_bounds = array<i64: 64, 32>}, {pipeline_mode = #tpu.pipeline_mode<synchronous>, transform_indices = @transform_4, window_bounds = array<i64: 1, 32>}, {transform_indices = @transform_5, window_bounds = array<i64: 16, 32>}]} {
    %c0 = arith.constant 0 : index
    %c0_0 = arith.constant 0 : index
    %0 = vector.load %arg2[%c0, %c0_0] : memref<16x32xf32, #tpu.memory_space<vmem>>, vector<16x32xf32>
    %1 = arith.truncf %0 : vector<16x32xf32> to vector<16x32xbf16>
    %c0_1 = arith.constant 0 : index
    %c0_2 = arith.constant 0 : index
    %2 = vector.load %arg3[%c0_1, %c0_2] : memref<32x64xbf16, #tpu.memory_space<vmem>>, vector<32x64xbf16>
    %cst = arith.constant dense<0.000000e+00> : vector<16x64xf32>
    %3 = tpu.matmul %1, %2, %cst {dimension_numbers = #tpu.dot_dimension_numbers<[1], [0], [0], [1], [0, 0, 1, 1], [], []>} : vector<16x32xbf16>, vector<32x64xbf16>, vector<16x64xf32> -> vector<16x64xf32>
    %c0_3 = arith.constant 0 : index
    %c0_4 = arith.constant 0 : index
    %4 = vector.load %arg4[%c0_3, %c0_4] : memref<1x64xf32, #tpu.memory_space<vmem>>, vector<1x64xf32>
    %5 = vector.broadcast %4 : vector<1x64xf32> to vector<16x64xf32>
    %6 = arith.addf %3, %5 : vector<16x64xf32>
    %7 = arith.mulf %6, %6 : vector<16x64xf32>
    %8 = arith.mulf %6, %7 : vector<16x64xf32>
    %cst_5 = arith.constant 4.471500e-02 : f32
    %9 = vector.broadcast %cst_5 : f32 to vector<16x64xf32>
    %10 = arith.mulf %9, %8 : vector<16x64xf32>
    %11 = arith.addf %6, %10 : vector<16x64xf32>
    %cst_6 = arith.constant 0.797884583 : f32
    %12 = vector.broadcast %cst_6 : f32 to vector<16x64xf32>
    %13 = arith.mulf %12, %11 : vector<16x64xf32>
    %14 = math.tanh %13 : vector<16x64xf32>
    %cst_7 = arith.constant 1.000000e+00 : f32
    %15 = vector.broadcast %cst_7 : f32 to vector<16x64xf32>
    %16 = arith.addf %15, %14 : vector<16x64xf32>
    %cst_8 = arith.constant 5.000000e-01 : f32
    %17 = vector.broadcast %cst_8 : f32 to vector<16x64xf32>
    %18 = arith.mulf %17, %16 : vector<16x64xf32>
    %19 = arith.mulf %6, %18 : vector<16x64xf32>
    %20 = arith.truncf %19 : vector<16x64xf32> to vector<16x64xbf16>
    %c0_9 = arith.constant 0 : index
    %c0_10 = arith.constant 0 : index
    %21 = vector.load %arg5[%c0_9, %c0_10] : memref<64x32xbf16, #tpu.memory_space<vmem>>, vector<64x32xbf16>
    %cst_11 = arith.constant dense<0.000000e+00> : vector<16x32xf32>
    %22 = tpu.matmul %20, %21, %cst_11 {dimension_numbers = #tpu.dot_dimension_numbers<[1], [0], [0], [1], [0, 0, 1, 1], [], []>} : vector<16x64xbf16>, vector<64x32xbf16>, vector<16x32xf32> -> vector<16x32xf32>
    %c0_12 = arith.constant 0 : index
    %c0_13 = arith.constant 0 : index
    %23 = vector.load %arg6[%c0_12, %c0_13] : memref<1x32xf32, #tpu.memory_space<vmem>>, vector<1x32xf32>
    %24 = vector.broadcast %23 : vector<1x32xf32> to vector<16x32xf32>
    %25 = arith.addf %22, %24 : vector<16x32xf32>
    %c0_14 = arith.constant 0 : index
    %c0_15 = arith.constant 0 : index
    %26 = vector.load %arg7[%c0_14, %c0_15] : memref<16x32xf32, #tpu.memory_space<vmem>>, vector<16x32xf32>
    tpu.vector_store %arg7[%c0_14, %c0_15], %25 {strides = array<i32>} : memref<16x32xf32, #tpu.memory_space<vmem>>, vector<16x32xf32>,
    return
  }
  func.func @transform_0(%arg0: i32, %arg1: memref<1xi32, #tpu.memory_space<smem>>) -> (i32, i32) {
    %c0_i32 = arith.constant 0 : i32
    %c0_i32_0 = arith.constant 0 : i32
    return %arg0, %c0_i32 : i32, i32
  }
  func.func @transform_1(%arg0: i32, %arg1: memref<1xi32, #tpu.memory_space<smem>>) -> (i32, i32) {
    %c0_i32 = arith.constant 0 : i32
    %c0_i32_0 = arith.constant 0 : i32
    %c0_i32_1 = arith.constant 0 : i32
    return %c0_i32, %c0_i32_0 : i32, i32
  }
  func.func @transform_2(%arg0: i32, %arg1: memref<1xi32, #tpu.memory_space<smem>>) -> (i32, i32) {
    %c0_i32 = arith.constant 0 : i32
    %c0_i32_0 = arith.constant 0 : i32
    %c0_i32_1 = arith.constant 0 : i32
    return %c0_i32, %c0_i32_0 : i32, i32
  }
  func.func @transform_3(%arg0: i32, %arg1: memref<1xi32, #tpu.memory_space<smem>>) -> (i32, i32) {
    %c0_i32 = arith.constant 0 : i32
    %c0_i32_0 = arith.constant 0 : i32
    %c0_i32_1 = arith.constant 0 : i32
    return %c0_i32, %c0_i32_0 : i32, i32
  }
  func.func @transform_4(%arg0: i32, %arg1: memref<1xi32, #tpu.memory_space<smem>>) -> (i32, i32) {
    %c0_i32 = arith.constant 0 : i32
    %c0_i32_0 = arith.constant 0 : i32
    %c0_i32_1 = arith.constant 0 : i32
    return %c0_i32, %c0_i32_0 : i32, i32
  }
  func.func @transform_5(%arg0: i32, %arg1: memref<1xi32, #tpu.memory_space<smem>>) -> (i32, i32) {
    %c0_i32 = arith.constant 0 : i32
    %c0_i32_0 = arith.constant 0 : i32
    return %arg0, %c0_i32 : i32, i32
  }
}

</mosaic_0001>

<bundles_post_ra>
// kernel: tpu_custom_call.1
= control target key start
LH: loop header
LB: loop body
LE: loop exit
PB: predicated region body
PF: predicated region fallthrough
CT: control target
= control target key end

     0   :  { %v291_v1 = vmov 0.0   ;;  %vm292_vm0 = vmmov 0   ;;  %s367_s0 = inlined_call_operand.<no memory space> [shape: s32[1], index: 0, kind: input, shape index: {}]   ;;  %s368_s1 = inlined_call_operand.vmem [shape: f32[16,32], index: 1, kind: input, shape index: {}]   ;;  %s369_s2 = inlined_call_operand.vmem [shape: bf16[32,64], index: 2, kind: input, shape index: {}]   ;;  %s370_s3 = inlined_call_operand.vmem [shape: f32[1,64], index: 3, kind: input, shape index: {}]   ;;  %s371_s4 = inlined_call_operand.vmem [shape: bf16[64,32], index: 4, kind: input, shape index: {}]   ;;  %s372_s5 = inlined_call_operand.vmem [shape: f32[1,32], index: 5, kind: input, shape index: {}]   ;;  %s373_s6 = inlined_call_operand.hbm [shape: f32[16,32], index: 6, kind: output, shape index: {}]  }
   0x1   :  { %v259_v0 = vld [vmem:[%s369_s2 + $0x8] sm:$0xff]   ;;  %234 = vmatprep.subr.bf16.mxu0 %v291_v1  ;;  %242 = vmatprep.subr.bf16.mxu1 %v291_v1  ;;  %v260_v2 = vld [vmem:[%s369_s2] sm:$0xff]  }
   0x2   :  { %235 = vmatpush3.bf16.msra.mxu0 %v259_v0  ;;  %238 = vmatprep.mubr.msk.bf16.mxu0 %vm292_vm0, %v291_v1  ;;  %v24_v3 = vld [vmem:[%s368_s1] sm:$0xff]  ;;  %v25_v4 = vld [vmem:[%s368_s1 + $0x8] sm:$0xff] }
   0x3   :  { %236 = vmatprep.subr.bf16.mxu0 %v291_v1  ;;  %250 = vmatprep.mubr.msk.bf16.mxu1 %vm292_vm0, %v291_v1  ;;  %v26_v5 = vpack.c.bf16 %v25_v4, %v24_v3 }
   0x4   :  { %12 = vsyncpa [#allocation5], 0  ;;  %vm50_vm1 = vcmask 261120   ;;  %v261_v6 = vld [vmem:[%s371_s4 + $0x18] sm:$0xff]   ;;  %v262_v7 = vld [vmem:[%s371_s4 + $0x10] sm:$0xff]   ;;  %vm153_vm2 = vcmask 523264  }
   0x5   :  { %243 = vmatpush3.bf16.msra.mxu1 %v261_v6  ;;  %v263_v8 = vld [vmem:[%s371_s4 + $0x8] sm:$0xff]   ;;  %v264_v9 = vld [vmem:[%s371_s4] sm:$0xff]   ;;  %s293_s12 = smov [#allocation4]  }
   0x6   :  { %237 = vmatpush3.bf16.msra.mxu0 %v260_v2  ;;  %244 = vmatprep.subr.bf16.mxu1 %v291_v1  ;;  %v216_v10 = vld [vmem:[%s370_s3] ss:$0 sm:$0xff]  ;;  %s205_s13 = sshll.u32 %s293_s12, 4  ;;  %s206_s13 = int_to_ptr.vmem [resolvable:$true] %s205_s13 }
   0x7   :  { %v220_v36 = vld [vmem:[%s372_s5] ss:$0 sm:$0xff]  ;;  %s269_s14 = scalar_lea.vmem %s206_s13, 256  ;;  %p274_p1 = scmp.lt.s32.totalorder %s206_s13, %s206_s13 }
   0x8   :  { %p270_p0 = scmp.ne.s32.totalorder %s206_s13, %s269_s14  ;;  %p275_p2 = scmp.lt.s32.totalorder %s269_s14, %s269_s14 }
   0x9   :  { %239 = vmatmul.mubr.msk.bf16.vlgmr.msra.gmra.mxu0 %vm50_vm1, %v26_v5  ;;  %245 = vmatpush3.bf16.msra.mxu1 %v262_v7 }
   0xa   :  { %246 = vmatprep.subr.bf16.mxu1 %v291_v1  ;;  %p276_p3 = por %p275_p2, %p274_p1 }
   0xc   :  { %p277_p4 = pnand %p276_p3, %p270_p0 }
   0xd   :  { %247 = vmatpush3.bf16.msra.mxu1 %v263_v8 }
   0xe   :  { %248 = vmatprep.subr.bf16.mxu1 %v291_v1 }
  0x11   :  { %249 = vmatpush3.bf16.msra.mxu1 %v264_v9 }
  0xc9   :  { %v88_v11 = vpop.f32.mrf.mxu0 }
  0xca   :  { %v89_v12 = vadd.f32 %v216_v10, %v88_v11 }
  0xcb   :  { %v240_v13 = vpop.f32.mrf.mxu0 }
  0xcc   :  { %v95_v14 = vmul.f32 %v89_v12, %v89_v12 }
  0xcd   :  { %v91_v15 = vpop.f32.mrf.mxu0 }
  0xce   :  { %v97_v16 = vmul.f32 %v95_v14, %v89_v12  ;;  %v92_v17 = vadd.f32 %v216_v10, %v91_v15 }
  0xcf   :  { %v241_v18 = vpop.f32.mrf.mxu0 }
  0xd0   :  { %v99_v19 = vmul.f32 0.044715, %v97_v16  ;;  %v96_v20 = vmul.f32 %v92_v17, %v92_v17 }
  0xd2   :  { %v101_v21 = vadd.f32 %v99_v19, %v89_v12  ;;  %v98_v22 = vmul.f32 %v96_v20, %v92_v17 }
  0xd4   :  { %v103_v23 = vmul.f32 0.7978846, %v101_v21  ;;  %v100_v24 = vmul.f32 0.044715, %v98_v22 }
  0xd6   :  { %265 = vtanh.f32 %v103_v23  ;;  %v102_v25 = vadd.f32 %v100_v24, %v92_v17 }
  0xd8   :  { %v104_v26 = vmul.f32 0.7978846, %v102_v25 }
  0xda   :  { %267 = vtanh.f32 %v104_v26 }
  0xe3   :  { %v266_v27 = vpop.eup %265 }
  0xe4   :  { %v107_v28 = vadd.f32 1.0, %v266_v27 }
  0xe6   :  { %v109_v30 = vmul.f32 0.5, %v107_v28 }
  0xe7   :  { %v268_v29 = vpop.eup %267 }
  0xe8   :  { %v108_v31 = vadd.f32 1.0, %v268_v29  ;;  %v111_v33 = vmul.f32 %v109_v30, %v89_v12 }
  0xea   :  { %v110_v32 = vmul.f32 0.5, %v108_v31 }
  0xec   :  { %v112_v34 = vmul.f32 %v110_v32, %v92_v17 }
  0xee   :  { %v113_v35 = vpack.c.bf16 %v112_v34, %v111_v33 }
  0xf0   :  { %251 = vmatmul.mubr.msk.bf16.vlgmr.msra.gmra.mxu1 %vm153_vm2, %v113_v35 }
 0x1b0   :  { %v191_v37 = vpop.f32.mrf.mxu1 }
 0x1b1   :  { %v192_v38 = vadd.f32 %v220_v36, %v191_v37 }
 0x1b2   :  { %v252_v39 = vpop.f32.mrf.mxu1 }
 0x1b3   :  { %198 = vst.msk [vmem:[#allocation4] sm:$0xff] %vm50_vm1, %v192_v38 }
 0x1b4   :  { %v194_v40 = vpop.f32.mrf.mxu1 }
 0x1b5   :  { %v195_v41 = vadd.f32 %v220_v36, %v194_v40 }
 0x1b6   :  { %v253_v42 = vpop.f32.mrf.mxu1 }
 0x1b7   :  { %199 = vst.msk [vmem:[#allocation4 + $0x8] sm:$0xff] %vm50_vm1, %v195_v41 }
 0x1b8   :  { %280 = shalt.err (!%p277_p4)
}
 0x1b9   :  { %s294_s5 = smov 128   ;;  %s295_s15 = smov 8  }
 0x1ba   :  { %211 = dma.vmem_to_hbm [thread:$0]  %s206_s13, 256, %s373_s6, [#allocation5], %s294_s5, %s294_s5, %s295_s15  }
 0x1bb   :  { %289 = dma.done.wait [#allocation5], 256  }
 0x1bc   :  { %290 = vsyncadd [#allocation5], 4294967040 }
 0x1bd   :  { %215 = vsyncpa [#allocation5], 1 }

</bundles_post_ra>
